<compile_context>
chip_gen: v7x
topology: tpu7x:2x2x1
jax: 0.10.0
libtpu: 0.0.40
codegen_flags: <defaults>
</compile_context>

<pallas_src>
import jax
import jax.numpy as jnp
from jax.experimental import pallas as pl
from jax.experimental.pallas import tpu as pltpu


def _round_up(x, m):
    return ((x + m - 1) // m) * m


def _vmem_capacity_bytes():
    try:
        return int(pltpu.get_tpu_info().vmem_capacity_bytes)
    except Exception:
        return 64 * 1024 * 1024  # v7x per-TensorCore capacity; safe on every chip


# ---------------------------------------------------------------------------
# Kernels
# ---------------------------------------------------------------------------

def _fused_kernel(adj_ref, xs_ref, nd_ref, ns_ref, w1_ref, b1_ref, w2_ref,
                  b2_ref, o_ref):
    """Both GraphConv layers with the whole adjacency resident in VMEM.

    adj_ref : (N, N)   bf16  raw (un-normalized) adjacency, [dst, src]
    xs_ref  : (N, Fin) bf16  node features pre-scaled by norm_src
    nd_ref  : (N, 1)   f32   norm_dst (0 on padded rows)
    ns_ref  : (N, 1)   f32   norm_src (0 on padded rows)
    """
    # ---- layer 1: h = relu(norm_dst * (A @ (norm_src * x)) @ W1 + b1) ----
    h = jnp.dot(adj_ref[...], xs_ref[...], preferred_element_type=jnp.float32)
    h = nd_ref[...] * h
    h = jnp.dot(h.astype(jnp.bfloat16), w1_ref[...],
                preferred_element_type=jnp.float32) + b1_ref[...]
    h = jnp.maximum(h, 0.0)
    # TODO(synk): training-mode dropout(p=0.5) between layers not modeled (eval identity).
    # ---- layer 2, reordered by associativity:
    #   out = norm_dst * (A @ (norm_src * h)) @ W2 + b2
    #       = norm_dst * (A @ (norm_src * (h @ W2))) + b2
    z = ns_ref[...] * jnp.dot(h.astype(jnp.bfloat16), w2_ref[...],
                              preferred_element_type=jnp.float32)
    o = jnp.dot(adj_ref[...], z.astype(jnp.bfloat16),
                preferred_element_type=jnp.float32)
    o_ref[...] = (nd_ref[...] * o + b2_ref[...]).astype(o_ref.dtype)


def _layer1_kernel(adj_ref, xs_ref, nd_ref, ns_ref, w1_ref, b1_ref, w2_ref,
                   z_ref):
    """Streamed dst-row tile of layer 1 (+ layer-2 projection folded in).

    z_tile = norm_src * (relu(norm_dst * (A_tile @ xs) @ W1 + b1) @ W2)
    """
    h = jnp.dot(adj_ref[...], xs_ref[...], preferred_element_type=jnp.float32)
    h = nd_ref[...] * h
    h = jnp.dot(h.astype(jnp.bfloat16), w1_ref[...],
                preferred_element_type=jnp.float32) + b1_ref[...]
    h = jnp.maximum(h, 0.0)
    # TODO(synk): training-mode dropout(p=0.5) between layers not modeled (eval identity).
    z = jnp.dot(h.astype(jnp.bfloat16), w2_ref[...],
                preferred_element_type=jnp.float32)
    z_ref[...] = (ns_ref[...] * z).astype(z_ref.dtype)


def _layer2_kernel(adj_ref, z_ref, nd_ref, b2_ref, o_ref):
    """Streamed dst-row tile of layer 2: out = norm_dst * (A_tile @ z) + b2."""
    o = jnp.dot(adj_ref[...], z_ref[...], preferred_element_type=jnp.float32)
    o_ref[...] = (nd_ref[...] * o + b2_ref[...]).astype(o_ref.dtype)


# ---------------------------------------------------------------------------
# Planning / wrapper
# ---------------------------------------------------------------------------

def make_gcn_plan(num_nodes, in_size, hid_size, out_size, *, force_streamed=False):
    """Pick padding, tiling and fusion against the chip's explicit VMEM budget."""
    fin_p = _round_up(in_size, 128)
    hid_p = _round_up(hid_size, 128)
    out_p = _round_up(out_size, 128)
    n_lane = _round_up(max(num_nodes, 8), 128)       # lane-dense adjacency columns

    vmem_cap = _vmem_capacity_bytes()                # 64 MiB/TC (v7x), 128 MiB (v5e/v6e)
    vmem_limit = min((3 * vmem_cap) // 4, 112 * 1024 * 1024)
    budget = (17 * vmem_limit) // 20                 # 85%: headroom for compiler scratch

    # ---- fused path: whole adjacency resident, both layers in one call ----
    adj_bytes = n_lane * n_lane * 2
    small = (n_lane * fin_p * 2 + fin_p * hid_p * 2 + hid_p * 4
             + hid_p * out_p * 2 + out_p * 4 + 2 * n_lane * 4
             + n_lane * out_p * 4)                   # xs, W1, b1, W2, b2, norms, out
    inter = 2 * n_lane * (hid_p + out_p) * 4         # in-kernel f32 intermediates (h, z)
    fused = (not force_streamed) and (2 * (adj_bytes + small) + inter <= budget)
    if fused:
        return dict(fused=True, tm=n_lane, n_p=n_lane, fin_p=fin_p, hid_p=hid_p,
                    out_p=out_p, n=num_nodes, vmem_limit=vmem_limit)

    # ---- streamed path: dst-row adjacency tiles, small operands VMEM-resident ----
    n_est = n_lane + 1024                            # n_p <= n_lane + tm <= this
    res1 = n_est * fin_p * 2 + fin_p * hid_p * 2 + hid_p * 4 + hid_p * out_p * 2
    res2 = n_est * out_p * 2 + out_p * 4
    resident = 2 * max(res1, res2)                   # constant blocks still double-buffered
    per_row = 4 * n_est + 8 * out_p + 32             # 2x adj row (bf16) + 2x out row + norms
    tm = (budget - resident) // per_row
    # TODO(synk): for graphs so large that the resident x/z no longer fit next to the
    # adjacency tile (N >~ 100K on v7x), a second "arbitrary" grid axis over the src
    # dimension with an f32 accumulator would be needed; not implemented here.
    tm = max(8, min(1024, (tm // 8) * 8))
    if tm >= 256:
        tm = (tm // 256) * 256                       # align to the 256x256 MXU (v6e/v7x)
    if tm >= n_lane and n_lane > 8:
        tm = max(8, ((n_lane // 2) // 8) * 8)        # keep >= 2 grid steps (v7x megacore)
    n_p = _round_up(n_lane, tm)
    return dict(fused=False, tm=tm, n_p=n_p, fin_p=fin_p, hid_p=hid_p,
                out_p=out_p, n=num_nodes, vmem_limit=vmem_limit)


def prepare_adjacency(adj, plan):
    """One-time bf16 cast + tile-aligned pad of the dense [dst, src] adjacency.

    For a static graph this result should be cached / hoisted out of the
    per-step forward so no N^2 pre-pass remains on the hot path.
    """
    n, n_p = plan["n"], plan["n_p"]
    return jnp.zeros((n_p, n_p), jnp.bfloat16).at[:n, :n].set(adj.astype(jnp.bfloat16))


def gcn_forward(x, adj_p, norm_src, norm_dst, w1, b1, w2, b2, plan):
    n, n_p, tm = plan["n"], plan["n_p"], plan["tm"]
    fin_p, hid_p, out_p = plan["fin_p"], plan["hid_p"], plan["out_p"]
    fin, hid, out = x.shape[1], w1.shape[1], w2.shape[1]

    # norm_src folded into x here (O(N*Fin)); norm_dst and the layer-2 norm_src
    # are applied as per-row vector scalings inside the kernels.
    xs = (norm_src.reshape(n, 1) * x).astype(jnp.bfloat16)
    xs_p = jnp.zeros((n_p, fin_p), jnp.bfloat16).at[:n, :fin].set(xs)
    nd_p = jnp.zeros((n_p, 1), jnp.float32).at[:n].set(norm_dst.reshape(n, 1))
    ns_p = jnp.zeros((n_p, 1), jnp.float32).at[:n].set(norm_src.reshape(n, 1))
    w1_p = jnp.zeros((fin_p, hid_p), jnp.bfloat16).at[:fin, :hid].set(w1.astype(jnp.bfloat16))
    b1_p = jnp.zeros((1, hid_p), jnp.float32).at[:, :hid].set(b1.reshape(1, hid))
    w2_p = jnp.zeros((hid_p, out_p), jnp.bfloat16).at[:hid, :out].set(w2.astype(jnp.bfloat16))
    b2_p = jnp.zeros((1, out_p), jnp.float32).at[:, :out].set(b2.reshape(1, out))

    params = pltpu.CompilerParams(
        dimension_semantics=("arbitrary",) if plan["fused"] else ("parallel",),
        vmem_limit_bytes=int(plan["vmem_limit"]),
    )

    def rows(width):      # dst-row-tiled operand (streamed / double-buffered)
        return pl.BlockSpec((tm, width), lambda i: (i, 0))

    def resident(shape):  # grid-invariant operand, fully VMEM-resident
        return pl.BlockSpec(shape, lambda i: (0,) * len(shape))

    if plan["fused"]:
        cost = pl.CostEstimate(
            flops=int(2 * n_p * n_p * (fin_p + out_p)
                      + 2 * n_p * fin_p * hid_p + 2 * n_p * hid_p * out_p),
            transcendentals=0,
            bytes_accessed=int(adj_p.size * 2 + xs_p.size * 2
                               + (w1_p.size + w2_p.size) * 2
                               + (b1_p.size + b2_p.size) * 4
                               + 2 * n_p * 4 + n_p * out_p * 4),
        )
        y = pl.pallas_call(
            _fused_kernel,
            out_shape=jax.ShapeDtypeStruct((n_p, out_p), jnp.float32),
            grid=(1,),
            in_specs=[resident(adj_p.shape), resident(xs_p.shape),
                      resident(nd_p.shape), resident(ns_p.shape),
                      resident(w1_p.shape), resident(b1_p.shape),
                      resident(w2_p.shape), resident(b2_p.shape)],
            out_specs=resident((n_p, out_p)),
            compiler_params=params,
            cost_estimate=cost,
        )(adj_p, xs_p, nd_p, ns_p, w1_p, b1_p, w2_p, b2_p)
        return y[:n, :out]

    grid = (n_p // tm,)

    cost1 = pl.CostEstimate(
        flops=int(2 * n_p * n_p * fin_p + 2 * n_p * fin_p * hid_p + 2 * n_p * hid_p * out_p),
        transcendentals=0,
        bytes_accessed=int(adj_p.size * 2 + xs_p.size * 2 + w1_p.size * 2 + w2_p.size * 2
                           + b1_p.size * 4 + 2 * n_p * 4 + n_p * out_p * 2),
    )
    z = pl.pallas_call(
        _layer1_kernel,
        out_shape=jax.ShapeDtypeStruct((n_p, out_p), jnp.bfloat16),
        grid=grid,
        in_specs=[rows(n_p), resident(xs_p.shape), rows(1), rows(1),
                  resident(w1_p.shape), resident(b1_p.shape), resident(w2_p.shape)],
        out_specs=rows(out_p),
        compiler_params=params,
        cost_estimate=cost1,
    )(adj_p, xs_p, nd_p, ns_p, w1_p, b1_p, w2_p)

    cost2 = pl.CostEstimate(
        flops=int(2 * n_p * n_p * out_p),
        transcendentals=0,
        bytes_accessed=int(adj_p.size * 2 + z.size * 2 + b2_p.size * 4
                           + n_p * 4 + n_p * out_p * 4),
    )
    y = pl.pallas_call(
        _layer2_kernel,
        out_shape=jax.ShapeDtypeStruct((n_p, out_p), jnp.float32),
        grid=grid,
        in_specs=[rows(n_p), resident(z.shape), rows(1), resident(b2_p.shape)],
        out_specs=rows(out_p),
        compiler_params=params,
        cost_estimate=cost2,
    )(adj_p, z, nd_p, b2_p)
    return y[:n, :out]


def xavier_uniform(key, shape):
    fan_in, fan_out = shape
    limit = jnp.sqrt(6.0 / (fan_in + fan_out))
    return jax.random.uniform(key, shape, jnp.float32, -limit, limit)


if __name__ == "__main__":
    # Small synthetic graph + features, deterministic.
    N = 32
    in_size, hid_size, out_size = 16, 32, 8

    key = jax.random.PRNGKey(0)
    k_feat, k_mask, k_w, k_w1, k_w2 = jax.random.split(key, 5)

    x = jax.random.normal(k_feat, (N, in_size), jnp.float32)

    # Random sparse directed graph with edge "distance" weights.
    # mask[dst, src] = 1 if edge src->dst exists.
    mask = (jax.random.uniform(k_mask, (N, N)) < 0.3).astype(jnp.float32)
    dist = jax.random.uniform(k_w, (N, N), jnp.float32, 0.1, 1.0)
    adj = mask * dist                                   # weighted dense adjacency [dst, src]

    # DGL GraphConv norms: unweighted degrees, clamped to >= 1.
    out_deg = jnp.clip(jnp.sum(mask, axis=0), 1.0)      # per-src: #outgoing edges
    in_deg = jnp.clip(jnp.sum(mask, axis=1), 1.0)       # per-dst: #incoming edges
    norm_src = (out_deg ** -0.5).reshape(N, 1)
    norm_dst = (in_deg ** -0.5).reshape(N, 1)

    # Parameters (xavier_uniform weights, zero biases — matches DGL GraphConv init).
    w1 = xavier_uniform(k_w1, (in_size, hid_size))
    b1 = jnp.zeros((1, hid_size), jnp.float32)
    w2 = xavier_uniform(k_w2, (hid_size, out_size))
    b2 = jnp.zeros((1, out_size), jnp.float32)

    # Run both code paths (fused for small graphs, streamed for large ones).
    outs = {}
    for force_streamed in (False, True):
        plan = make_gcn_plan(N, in_size, hid_size, out_size, force_streamed=force_streamed)
        adj_p = prepare_adjacency(adj, plan)            # one-time, cacheable for a static graph
        y = gcn_forward(x, adj_p, norm_src, norm_dst, w1, b1, w2, b2, plan)
        y = jax.block_until_ready(y)
        assert y.shape == (N, out_size)
        outs["fused" if plan["fused"] else "streamed"] = y

    # Pure-JAX reference mirroring the kernel math (bf16 adj / weights / activations).
    adj_b = adj.astype(jnp.bfloat16)
    xs = (norm_src * x).astype(jnp.bfloat16)
    h = norm_dst * jnp.dot(adj_b, xs, preferred_element_type=jnp.float32)
    h = jnp.maximum(jnp.dot(h.astype(jnp.bfloat16), w1.astype(jnp.bfloat16),
                            preferred_element_type=jnp.float32) + b1, 0.0)
    z_ref = (norm_src * jnp.dot(h.astype(jnp.bfloat16), w2.astype(jnp.bfloat16),
                                preferred_element_type=jnp.float32)).astype(jnp.bfloat16)
    ref = norm_dst * jnp.dot(adj_b, z_ref, preferred_element_type=jnp.float32) + b2

    # Exact-f32 DGL GraphConv formulation (loose tolerance: bf16 operands in the kernel).
    def dgl_layer(h_, w, b, act):
        h_ = norm_src * h_
        h_ = adj @ h_
        h_ = norm_dst * h_
        h_ = h_ @ w + b
        return jnp.maximum(h_, 0.0) if act else h_

    ref_f32 = dgl_layer(dgl_layer(x, w1, b1, True), w2, b2, False)

    for name, y in outs.items():
        assert jnp.allclose(y, ref, atol=2e-2, rtol=2e-2), f"{name}: mismatch vs bf16 reference"
        assert jnp.allclose(y, ref_f32, atol=5e-2, rtol=5e-2), f"{name}: mismatch vs f32 DGL reference"

    print("KERNEL_OK")
</pallas_src>

<mosaic_0001>
module attributes {stable_mosaic.version = 11 : i64} {
  func.func @_fused_kernel(%arg0: i32, %arg1: memref<128x128xbf16, #tpu.memory_space<vmem>>, %arg2: memref<128x128xbf16, #tpu.memory_space<vmem>>, %arg3: memref<128x1xf32, #tpu.memory_space<vmem>>, %arg4: memref<128x1xf32, #tpu.memory_space<vmem>>, %arg5: memref<128x128xbf16, #tpu.memory_space<vmem>>, %arg6: memref<1x128xf32, #tpu.memory_space<vmem>>, %arg7: memref<128x128xbf16, #tpu.memory_space<vmem>>, %arg8: memref<1x128xf32, #tpu.memory_space<vmem>>, %arg9: memref<128x128xf32, #tpu.memory_space<vmem>>) attributes {dimension_semantics = [#tpu.dimension_semantics<arbitrary>], iteration_bounds = array<i64: 1>, scalar_prefetch = 0 : i64, scratch_operands = 0 : i64, tpu.core_type = #tpu.core_type<tc>, window_params = [{pipeline_mode = #tpu.pipeline_mode<synchronous>, transform_indices = @transform_0, window_bounds = array<i64: 128, 128>}, {pipeline_mode = #tpu.pipeline_mode<synchronous>, transform_indices = @transform_1, window_bounds = array<i64: 128, 128>}, {pipeline_mode = #tpu.pipeline_mode<synchronous>, transform_indices = @transform_2, window_bounds = array<i64: 128, 1>}, {pipeline_mode = #tpu.pipeline_mode<synchronous>, transform_indices = @transform_3, window_bounds = array<i64: 128, 1>}, {pipeline_mode = #tpu.pipeline_mode<synchronous>, transform_indices = @transform_4, window_bounds = array<i64: 128, 128>}, {pipeline_mode = #tpu.pipeline_mode<synchronous>, transform_indices = @transform_5, window_bounds = array<i64: 1, 128>}, {pipeline_mode = #tpu.pipeline_mode<synchronous>, transform_indices = @transform_6, window_bounds = array<i64: 128, 128>}, {pipeline_mode = #tpu.pipeline_mode<synchronous>, transform_indices = @transform_7, window_bounds = array<i64: 1, 128>}, {pipeline_mode = #tpu.pipeline_mode<synchronous>, transform_indices = @transform_8, window_bounds = array<i64: 128, 128>}]} {
    %c0 = arith.constant 0 : index
    %c0_0 = arith.constant 0 : index
    %0 = vector.load %arg1[%c0, %c0_0] : memref<128x128xbf16, #tpu.memory_space<vmem>>, vector<128x128xbf16>
    %c0_1 = arith.constant 0 : index
    %c0_2 = arith.constant 0 : index
    %1 = vector.load %arg2[%c0_1, %c0_2] : memref<128x128xbf16, #tpu.memory_space<vmem>>, vector<128x128xbf16>
    %cst = arith.constant dense<0.000000e+00> : vector<128x128xf32>
    %2 = tpu.matmul %0, %1, %cst {dimension_numbers = #tpu.dot_dimension_numbers<[1], [0], [0], [1], [0, 0, 1, 1], [], []>} : vector<128x128xbf16>, vector<128x128xbf16>, vector<128x128xf32> -> vector<128x128xf32>
    %c0_3 = arith.constant 0 : index
    %c0_4 = arith.constant 0 : index
    %3 = vector.load %arg3[%c0_3, %c0_4] : memref<128x1xf32, #tpu.memory_space<vmem>>, vector<128x1xf32>
    %4 = vector.broadcast %3 : vector<128x1xf32> to vector<128x128xf32>
    %5 = arith.mulf %4, %2 : vector<128x128xf32>
    %6 = arith.truncf %5 : vector<128x128xf32> to vector<128x128xbf16>
    %c0_5 = arith.constant 0 : index
    %c0_6 = arith.constant 0 : index
    %7 = vector.load %arg5[%c0_5, %c0_6] : memref<128x128xbf16, #tpu.memory_space<vmem>>, vector<128x128xbf16>
    %cst_7 = arith.constant dense<0.000000e+00> : vector<128x128xf32>
    %8 = tpu.matmul %6, %7, %cst_7 {dimension_numbers = #tpu.dot_dimension_numbers<[1], [0], [0], [1], [0, 0, 1, 1], [], []>} : vector<128x128xbf16>, vector<128x128xbf16>, vector<128x128xf32> -> vector<128x128xf32>
    %c0_8 = arith.constant 0 : index
    %c0_9 = arith.constant 0 : index
    %9 = vector.load %arg6[%c0_8, %c0_9] : memref<1x128xf32, #tpu.memory_space<vmem>>, vector<1x128xf32>
    %10 = vector.broadcast %9 : vector<1x128xf32> to vector<128x128xf32>
    %11 = arith.addf %8, %10 : vector<128x128xf32>
    %cst_10 = arith.constant 0.000000e+00 : f32
    %12 = vector.broadcast %cst_10 : f32 to vector<128x128xf32>
    %13 = arith.maximumf %11, %12 : vector<128x128xf32>
    %c0_11 = arith.constant 0 : index
    %c0_12 = arith.constant 0 : index
    %14 = vector.load %arg4[%c0_11, %c0_12] : memref<128x1xf32, #tpu.memory_space<vmem>>, vector<128x1xf32>
    %15 = arith.truncf %13 : vector<128x128xf32> to vector<128x128xbf16>
    %c0_13 = arith.constant 0 : index
    %c0_14 = arith.constant 0 : index
    %16 = vector.load %arg7[%c0_13, %c0_14] : memref<128x128xbf16, #tpu.memory_space<vmem>>, vector<128x128xbf16>
    %cst_15 = arith.constant dense<0.000000e+00> : vector<128x128xf32>
    %17 = tpu.matmul %15, %16, %cst_15 {dimension_numbers = #tpu.dot_dimension_numbers<[1], [0], [0], [1], [0, 0, 1, 1], [], []>} : vector<128x128xbf16>, vector<128x128xbf16>, vector<128x128xf32> -> vector<128x128xf32>
    %18 = vector.broadcast %14 : vector<128x1xf32> to vector<128x128xf32>
    %19 = arith.mulf %18, %17 : vector<128x128xf32>
    %c0_16 = arith.constant 0 : index
    %c0_17 = arith.constant 0 : index
    %20 = vector.load %arg1[%c0_16, %c0_17] : memref<128x128xbf16, #tpu.memory_space<vmem>>, vector<128x128xbf16>
    %21 = arith.truncf %19 : vector<128x128xf32> to vector<128x128xbf16>
    %cst_18 = arith.constant dense<0.000000e+00> : vector<128x128xf32>
    %22 = tpu.matmul %20, %21, %cst_18 {dimension_numbers = #tpu.dot_dimension_numbers<[1], [0], [0], [1], [0, 0, 1, 1], [], []>} : vector<128x128xbf16>, vector<128x128xbf16>, vector<128x128xf32> -> vector<128x128xf32>
    %c0_19 = arith.constant 0 : index
    %c0_20 = arith.constant 0 : index
    %23 = vector.load %arg3[%c0_19, %c0_20] : memref<128x1xf32, #tpu.memory_space<vmem>>, vector<128x1xf32>
    %24 = vector.broadcast %23 : vector<128x1xf32> to vector<128x128xf32>
    %25 = arith.mulf %24, %22 : vector<128x128xf32>
    %c0_21 = arith.constant 0 : index
    %c0_22 = arith.constant 0 : index
    %26 = vector.load %arg8[%c0_21, %c0_22] : memref<1x128xf32, #tpu.memory_space<vmem>>, vector<1x128xf32>
    %27 = vector.broadcast %26 : vector<1x128xf32> to vector<128x128xf32>
    %28 = arith.addf %25, %27 : vector<128x128xf32>
    %c0_23 = arith.constant 0 : index
    %c0_24 = arith.constant 0 : index
    %29 = vector.load %arg9[%c0_23, %c0_24] : memref<128x128xf32, #tpu.memory_space<vmem>>, vector<128x128xf32>
    tpu.vector_store %arg9[%c0_23, %c0_24], %28 {strides = array<i32>} : memref<128x128xf32, #tpu.memory_space<vmem>>, vector<128x128xf32>,
    return
  }
  func.func @transform_0(%arg0: i32) -> (i32, i32) {
    %c0_i32 = arith.constant 0 : i32
    %c0_i32_0 = arith.constant 0 : i32
    %c0_i32_1 = arith.constant 0 : i32
    return %c0_i32, %c0_i32_0 : i32, i32
  }
  func.func @transform_1(%arg0: i32) -> (i32, i32) {
    %c0_i32 = arith.constant 0 : i32
    %c0_i32_0 = arith.constant 0 : i32
    %c0_i32_1 = arith.constant 0 : i32
    return %c0_i32, %c0_i32_0 : i32, i32
  }
  func.func @transform_2(%arg0: i32) -> (i32, i32) {
    %c0_i32 = arith.constant 0 : i32
    %c0_i32_0 = arith.constant 0 : i32
    %c0_i32_1 = arith.constant 0 : i32
    return %c0_i32, %c0_i32_0 : i32, i32
  }
  func.func @transform_3(%arg0: i32) -> (i32, i32) {
    %c0_i32 = arith.constant 0 : i32
    %c0_i32_0 = arith.constant 0 : i32
    %c0_i32_1 = arith.constant 0 : i32
    return %c0_i32, %c0_i32_0 : i32, i32
  }
  func.func @transform_4(%arg0: i32) -> (i32, i32) {
    %c0_i32 = arith.constant 0 : i32
    %c0_i32_0 = arith.constant 0 : i32
    %c0_i32_1 = arith.constant 0 : i32
    return %c0_i32, %c0_i32_0 : i32, i32
  }
  func.func @transform_5(%arg0: i32) -> (i32, i32) {
    %c0_i32 = arith.constant 0 : i32
    %c0_i32_0 = arith.constant 0 : i32
    %c0_i32_1 = arith.constant 0 : i32
    return %c0_i32, %c0_i32_0 : i32, i32
  }
  func.func @transform_6(%arg0: i32) -> (i32, i32) {
    %c0_i32 = arith.constant 0 : i32
    %c0_i32_0 = arith.constant 0 : i32
    %c0_i32_1 = arith.constant 0 : i32
    return %c0_i32, %c0_i32_0 : i32, i32
  }
  func.func @transform_7(%arg0: i32) -> (i32, i32) {
    %c0_i32 = arith.constant 0 : i32
    %c0_i32_0 = arith.constant 0 : i32
    %c0_i32_1 = arith.constant 0 : i32
    return %c0_i32, %c0_i32_0 : i32, i32
  }
  func.func @transform_8(%arg0: i32) -> (i32, i32) {
    %c0_i32 = arith.constant 0 : i32
    %c0_i32_0 = arith.constant 0 : i32
    %c0_i32_1 = arith.constant 0 : i32
    return %c0_i32, %c0_i32_0 : i32, i32
  }
}

</mosaic_0001>

<bundles_post_ra>
// kernel: tpu_custom_call.1
= control target key start
LH: loop header
LB: loop body
LE: loop exit
PB: predicated region body
PF: predicated region fallthrough
CT: control target
= control target key end

     0   :  { %v1305_v2 = vmov 0   ;;  %s1678_s0 = inlined_call_operand.vmem [shape: bf16[128,128], index: 0, kind: input, shape index: {}]   ;;  %s1679_s1 = inlined_call_operand.vmem [shape: bf16[128,128], index: 1, kind: input, shape index: {}]   ;;  %s1680_s2 = inlined_call_operand.vmem [shape: f32[128,1], index: 2, kind: input, shape index: {}]   ;;  %s1681_s3 = inlined_call_operand.vmem [shape: f32[128,1], index: 3, kind: input, shape index: {}]   ;;  %s1682_s4 = inlined_call_operand.vmem [shape: bf16[128,128], index: 4, kind: input, shape index: {}]   ;;  %s1683_s5 = inlined_call_operand.vmem [shape: f32[1,128], index: 5, kind: input, shape index: {}]   ;;  %s1684_s6 = inlined_call_operand.vmem [shape: bf16[128,128], index: 6, kind: input, shape index: {}]   ;;  %s1685_s7 = inlined_call_operand.vmem [shape: f32[1,128], index: 7, kind: input, shape index: {}]   ;;  %s1686_s8 = inlined_call_operand.hbm [shape: f32[128,128], index: 8, kind: output, shape index: {}]  }
   0x1   :  { %v1249_v0 = vld [vmem:[%s1679_s1] sm:$0xff]   ;;  %v1250_v1 = vld [vmem:[%s1679_s1 + $0x8] sm:$0xff]   ;;  %1247 = vset.pattern.permute.xlu0 %v1305_v2  ;;  %1248 = vset.pattern.permute.xlu1 %v1305_v2  ;;  %v1251_v3 = vld [vmem:[%s1679_s1 + $0x10] sm:$0xff]  }
   0x2   :  { %1115 = vmatprep.subr.bf16.mxu0 %v1249_v0  ;;  %v1252_v4 = vld [vmem:[%s1679_s1 + $0x18] sm:$0xff]   ;;  %v1369_v5 = vld [vmem:[%s1678_s0] sm:$0xff]   ;;  %v258_v8 = vld [vmem:[%s1680_s2 + $0x10] sm:$0xff] }
   0x3   :  { %1116 = vmatpush3.bf16.msra.mxu0 %v1249_v0  ;;  %1131 = vmatprep.mubr.bf16.mxu0 %v1369_v5  ;;  %v1253_v6 = vld [vmem:[%s1679_s1 + $0x20] sm:$0xff]   ;;  %v1254_v9 = vld [vmem:[%s1679_s1 + $0x28] sm:$0xff]   ;;  %v259_v11 = vld [vmem:[%s1680_s2 + $0x18] sm:$0xff] }
   0x4   :  { %1117 = vmatprep.subr.bf16.mxu0 %v1250_v1  ;;  %v256_v7 = vld [vmem:[%s1680_s2] sm:$0xff]  ;;  %284 = vperm.xlu1 %1248, %v258_v8   ;;  %v257_v10 = vld [vmem:[%s1680_s2 + $0x8] sm:$0xff]  ;;  %v1255_v12 = vld [vmem:[%s1679_s1 + $0x30] sm:$0xff]  }
   0x5   :  { %274 = vperm.xlu0 %1247, %v256_v7   ;;  %v260_v13 = vld [vmem:[%s1680_s2 + $0x20] sm:$0xff]  ;;  %v261_v14 = vld [vmem:[%s1680_s2 + $0x28] sm:$0xff]  ;;  %v1256_v15 = vld [vmem:[%s1679_s1 + $0x38] sm:$0xff]  }
   0x6   :  { %v262_v16 = vld [vmem:[%s1680_s2 + $0x30] sm:$0xff]  ;;  %v263_v17 = vld [vmem:[%s1680_s2 + $0x38] sm:$0xff]  ;;  %v264_v18 = vld [vmem:[%s1680_s2 + $0x40] sm:$0xff] }
   0x7   :  { %1118 = vmatpush3.bf16.msra.mxu0 %v1250_v1  ;;  %v265_v19 = vld [vmem:[%s1680_s2 + $0x48] sm:$0xff]  ;;  %v1422_v21 = vld [vmem:[%s1678_s0 + $0x10] sm:$0xff]   ;;  %v267_v23 = vld [vmem:[%s1680_s2 + $0x58] sm:$0xff] }
   0x8   :  { %1119 = vmatprep.subr.bf16.mxu0 %v1251_v3  ;;  %289 = vperm.xlu1 %1248, %v259_v11   ;;  %v1417_v20 = vld [vmem:[%s1678_s0 + $0x8] sm:$0xff]   ;;  %v266_v22 = vld [vmem:[%s1680_s2 + $0x50] sm:$0xff]  ;;  %v268_v24 = vld [vmem:[%s1680_s2 + $0x60] sm:$0xff] }
   0x9   :  { %279 = vperm.xlu0 %1247, %v257_v10   ;;  %v269_v25 = vld [vmem:[%s1680_s2 + $0x68] sm:$0xff] }
   0xb   :  { %1120 = vmatpush3.bf16.msra.mxu0 %v1251_v3 }
   0xc   :  { %1121 = vmatprep.subr.bf16.mxu0 %v1252_v4  ;;  %299 = vperm.xlu1 %1248, %v261_v14  }
   0xd   :  { %294 = vperm.xlu0 %1247, %v260_v13  }
   0xf   :  { %1122 = vmatpush3.bf16.msra.mxu0 %v1252_v4 }
  0x10   :  { %1123 = vmatprep.subr.bf16.mxu0 %v1253_v6  ;;  %309 = vperm.xlu1 %1248, %v263_v17  }
  0x11   :  { %304 = vperm.xlu0 %1247, %v262_v16  }
  0x13   :  { %1124 = vmatpush3.bf16.msra.mxu0 %v1253_v6 }
  0x14   :  { %1125 = vmatprep.subr.bf16.mxu0 %v1254_v9  ;;  %319 = vperm.xlu1 %1248, %v265_v19  }
  0x15   :  { %314 = vperm.xlu0 %1247, %v264_v18  }
  0x17   :  { %1126 = vmatpush3.bf16.msra.mxu0 %v1254_v9 }
  0x18   :  { %1127 = vmatprep.subr.bf16.mxu0 %v1255_v12  ;;  %329 = vperm.xlu1 %1248, %v267_v23  }
  0x19   :  { %324 = vperm.xlu0 %1247, %v266_v22  }
  0x1b   :  { %1128 = vmatpush3.bf16.msra.mxu0 %v1255_v12 }
  0x1c   :  { %1129 = vmatprep.subr.bf16.mxu0 %v1256_v15 }
  0x1f   :  { %1130 = vmatpush3.bf16.msra.mxu0 %v1256_v15 }
  0x22   :  { %1132 = vmatmul.mubr.bf16.vlgmr.msra.gmra.mrb[0].mxu0 %v1417_v20 }
  0x23   :  { %1135 = vmatprep.mubr.bf16.mxu0 %v1422_v21 }
  0x24   :  { %13 = vsyncpa [#allocation3], 0  ;;  %v1441_v26 = vld [vmem:[%s1678_s0 + $0x18] sm:$0xff]   ;;  %v1446_v27 = vld [vmem:[%s1678_s0 + $0x20] sm:$0xff]   ;;  %334 = vperm.xlu0 %1247, %v268_v24   ;;  %339 = vperm.xlu1 %1248, %v269_v25  }
  0x25   :  { %v270_v28 = vld [vmem:[%s1680_s2 + $0x70] sm:$0xff]  ;;  %v271_v29 = vld [vmem:[%s1680_s2 + $0x78] sm:$0xff]  ;;  %v560_v30 = vld [vmem:[%s1681_s3] sm:$0xff] }
  0x26   :  { %v561_v31 = vld [vmem:[%s1681_s3 + $0x8] sm:$0xff]  ;;  %v1470_v33 = vld [vmem:[%s1678_s0 + $0x30] sm:$0xff]   ;;  %v563_v35 = vld [vmem:[%s1681_s3 + $0x18] sm:$0xff] }
  0x27   :  { %v1465_v32 = vld [vmem:[%s1678_s0 + $0x28] sm:$0xff]   ;;  %v562_v34 = vld [vmem:[%s1681_s3 + $0x10] sm:$0xff]  ;;  %v1265_v36 = vld [vmem:[%s1682_s4] sm:$0xff]  }
  0x28   :  { %344 = vperm.xlu0 %1247, %v270_v28   ;;  %349 = vperm.xlu1 %1248, %v271_v29   ;;  %v564_v37 = vld [vmem:[%s1681_s3 + $0x20] sm:$0xff]  ;;  %v565_v38 = vld [vmem:[%s1681_s3 + $0x28] sm:$0xff]  ;;  %v1492_v39 = vld [vmem:[%s1678_s0 + $0x38] sm:$0xff]  }
  0x29   :  { %1147 = vmatprep.subr.bf16.mxu1 %v1265_v36  ;;  %v1266_v40 = vld [vmem:[%s1682_s4 + $0x8] sm:$0xff]   ;;  %v566_v41 = vld [vmem:[%s1681_s3 + $0x30] sm:$0xff]  ;;  %v567_v42 = vld [vmem:[%s1681_s3 + $0x38] sm:$0xff] }
  0x2a   :  { %1136 = vmatmul.mubr.bf16.gmra.mrb[4].mxu0 %v1441_v26  ;;  %1148 = vmatpush3.bf16.msra.mxu1 %v1265_v36  ;;  %v1267_v43 = vld [vmem:[%s1682_s4 + $0x10] sm:$0xff]   ;;  %v568_v44 = vld [vmem:[%s1681_s3 + $0x40] sm:$0xff]  ;;  %v569_v45 = vld [vmem:[%s1681_s3 + $0x48] sm:$0xff] }
  0x2b   :  { %1139 = vmatprep.mubr.bf16.mxu0 %v1446_v27  ;;  %1149 = vmatprep.subr.bf16.mxu1 %v1266_v40  ;;  %v1268_v46 = vld [vmem:[%s1682_s4 + $0x18] sm:$0xff]   ;;  %v570_v47 = vld [vmem:[%s1681_s3 + $0x50] sm:$0xff]  ;;  %v1269_v49 = vld [vmem:[%s1682_s4 + $0x20] sm:$0xff]  }
  0x2c   :  { %747 = vperm.xlu0 %1247, %v560_v30   ;;  %752 = vperm.xlu1 %1248, %v561_v31   ;;  %v571_v48 = vld [vmem:[%s1681_s3 + $0x58] sm:$0xff]  ;;  %v572_v50 = vld [vmem:[%s1681_s3 + $0x60] sm:$0xff]  ;;  %v573_v51 = vld [vmem:[%s1681_s3 + $0x68] sm:$0xff] }
  0x2d   :  { %v1270_v52 = vld [vmem:[%s1682_s4 + $0x28] sm:$0xff]   ;;  %v574_v53 = vld [vmem:[%s1681_s3 + $0x70] sm:$0xff]  ;;  %v575_v54 = vld [vmem:[%s1681_s3 + $0x78] sm:$0xff] }
  0x2e   :  { %1150 = vmatpush3.bf16.msra.mxu1 %v1266_v40  ;;  %v1271_v55 = vld [vmem:[%s1682_s4 + $0x30] sm:$0xff]   ;;  %v1272_v56 = vld [vmem:[%s1682_s4 + $0x38] sm:$0xff]   ;;  %v1273_v57 = vld [vmem:[%s1684_s6] sm:$0xff]  }
  0x2f   :  { %1151 = vmatprep.subr.bf16.mxu1 %v1267_v43  ;;  %v1274_v58 = vld [vmem:[%s1684_s6 + $0x8] sm:$0xff]   ;;  %1179 = vmatprep.subr.bf16.mxu0 %v1273_v57  ;;  %v1275_v59 = vld [vmem:[%s1684_s6 + $0x10] sm:$0xff]   ;;  %v1276_v60 = vld [vmem:[%s1684_s6 + $0x18] sm:$0xff]  }
  0x30   :  { %757 = vperm.xlu0 %1247, %v562_v34   ;;  %762 = vperm.xlu1 %1248, %v563_v35   ;;  %v1277_v61 = vld [vmem:[%s1684_s6 + $0x20] sm:$0xff]   ;;  %v1278_v62 = vld [vmem:[%s1684_s6 + $0x28] sm:$0xff]  }
  0x31   :  { %1180 = vmatpush3.bf16.msra.mxu0 %v1273_v57 }
  0x32   :  { %1140 = vmatmul.mubr.bf16.gmra.mrb[8].mxu0 %v1465_v32  ;;  %1152 = vmatpush3.bf16.msra.mxu1 %v1267_v43 }
  0x33   :  { %1143 = vmatprep.mubr.bf16.mxu0 %v1470_v33  ;;  %1153 = vmatprep.subr.bf16.mxu1 %v1268_v46 }
  0x34   :  { %767 = vperm.xlu0 %1247, %v564_v37   ;;  %772 = vperm.xlu1 %1248, %v565_v38  }
  0x35   :  { %1181 = vmatprep.subr.bf16.mxu0 %v1274_v58 }
  0x36   :  { %1154 = vmatpush3.bf16.msra.mxu1 %v1268_v46  ;;  %1182 = vmatpush3.bf16.msra.mxu0 %v1274_v58 }
  0x37   :  { %1155 = vmatprep.subr.bf16.mxu1 %v1269_v49  ;;  %1183 = vmatprep.subr.bf16.mxu0 %v1275_v59 }
  0x38   :  { %777 = vperm.xlu0 %1247, %v566_v41   ;;  %782 = vperm.xlu1 %1248, %v567_v42  }
  0x3a   :  { %1144 = vmatmul.mubr.bf16.gmra.mrb[12].mxu0 %v1492_v39  ;;  %1156 = vmatpush3.bf16.msra.mxu1 %v1269_v49 }
  0x3b   :  { %1157 = vmatprep.subr.bf16.mxu1 %v1270_v52  ;;  %1184 = vmatpush3.bf16.msra.mxu0 %v1275_v59 }
  0x3c   :  { %787 = vperm.xlu0 %1247, %v568_v44   ;;  %792 = vperm.xlu1 %1248, %v569_v45  }
  0x3d   :  { %1185 = vmatprep.subr.bf16.mxu0 %v1276_v60 }
  0x3e   :  { %1158 = vmatpush3.bf16.msra.mxu1 %v1270_v52 }
  0x3f   :  { %1159 = vmatprep.subr.bf16.mxu1 %v1271_v55  ;;  %1186 = vmatpush3.bf16.msra.mxu0 %v1276_v60 }
  0x40   :  { %797 = vperm.xlu0 %1247, %v570_v47   ;;  %802 = vperm.xlu1 %1248, %v571_v48  }
  0x41   :  { %1187 = vmatprep.subr.bf16.mxu0 %v1277_v61 }
  0x42   :  { %1160 = vmatpush3.bf16.msra.mxu1 %v1271_v55 }
  0x43   :  { %1161 = vmatprep.subr.bf16.mxu1 %v1272_v56  ;;  %1188 = vmatpush3.bf16.msra.mxu0 %v1277_v61 }
  0x44   :  { %807 = vperm.xlu0 %1247, %v572_v50   ;;  %812 = vperm.xlu1 %1248, %v573_v51  }
  0x45   :  { %1189 = vmatprep.subr.bf16.mxu0 %v1278_v62 }
  0x46   :  { %1162 = vmatpush3.bf16.msra.mxu1 %v1272_v56 }
  0x47   :  { %1190 = vmatpush3.bf16.msra.mxu0 %v1278_v62 }
  0x48   :  { %817 = vperm.xlu0 %1247, %v574_v53   ;;  %822 = vperm.xlu1 %1248, %v575_v54  }
  0x83   :  { %v1566_v0 = vpop.permute.xlu1 %284 }
  0x84   :  { %v1564_v63 = vpop.permute.xlu0 %274 }
  0x87   :  { %v1570_v2 = vpop.permute.xlu1 %289 }
  0x88   :  { %v1568_v1 = vpop.permute.xlu0 %279 }
  0x8b   :  { %v1574_v4 = vpop.permute.xlu1 %299 }
  0x8c   :  { %v1572_v3 = vpop.permute.xlu0 %294 }
  0x8f   :  { %v1578_v9 = vpop.permute.xlu1 %309 }
  0x90   :  { %v1576_v7 = vpop.permute.xlu0 %304 }
  0x93   :  { %v1586_v19 = vpop.permute.xlu1 %319 }
  0x94   :  { %v1584_v18 = vpop.permute.xlu0 %314 }
  0x97   :  { %v1594_v36 = vpop.permute.xlu1 %329 }
  0x98   :  { %v1592_v34 = vpop.permute.xlu0 %324 }
  0xa3   :  { %v1596_v42 = vpop.permute.xlu0 %334  ;;  %v1600_v46 = vpop.permute.xlu1 %339 }
  0xa7   :  { %v1604_v52 = vpop.permute.xlu0 %344  ;;  %v1606_v54 = vpop.permute.xlu1 %349 }
  0xf5   :  { %v1133_v6 = vpop.f32.mrb[0].mxu0 }
  0xf6   :  { %v193_v8 = vpop.f32.mrb[1].mxu0  ;;  %v354_v11 = vmul.f32 %v1133_v6, %v1566_v0  ;;  %v1279_v6 = vld [vmem:[%s1684_s6 + $0x30] sm:$0xff]  }
  0xf7   :  { %v1134_v10 = vpop.f32.mrb[2].mxu0  ;;  %v352_v14 = vmul.f32 %v1564_v63, %v193_v8  ;;  %1191 = vmatprep.subr.bf16.mxu0 %v1279_v6  ;;  %v1280_v8 = vld [vmem:[%s1684_s6 + $0x38] sm:$0xff]  }
  0xf8   :  { %v355_v12 = vmul.f32 %v1134_v10, %v1570_v2  ;;  %v196_v13 = vpop.f32.mrb[3].mxu0  ;;  %1192 = vmatpush3.bf16.msra.mxu0 %v1279_v6  ;;  %v1033_v10 = vld [vmem:[%s1683_s5] ss:$0 sm:$0xff] }
  0xf9   :  { %v353_v15 = vmul.f32 %v1568_v1, %v196_v13  ;;  %1193 = vmatprep.subr.bf16.mxu0 %v1280_v8 }
  0xfa   :  { %v369_v16 = vpack.c.bf16 %v355_v12, %v354_v11 }
  0xfb   :  { %v368_v17 = vpack.c.bf16 %v353_v15, %v352_v14 }
  0xfc   :  { %1194 = vmatpush3.bf16.msra.mxu0 %v1280_v8 }
  0xfd   :  { %v1137_v22 = vpop.f32.mrb[4].mxu0  ;;  %1163 = vmatprep.mubr.bf16.mxu1 %v368_v17 }
  0xfe   :  { %v209_v23 = vpop.f32.mrb[5].mxu0  ;;  %1164 = vmatmul.mubr.bf16.vlgmr.msra.gmra.mrb[0].mxu1 %v369_v16  ;;  %v358_v25 = vmul.f32 %v1137_v22, %v1576_v7 }
  0xff   :  { %v1138_v24 = vpop.f32.mrb[6].mxu0  ;;  %v356_v30 = vmul.f32 %v1572_v3, %v209_v23 }
 0x100   :  { %v359_v28 = vmul.f32 %v1138_v24, %v1578_v9  ;;  %v212_v29 = vpop.f32.mrb[7].mxu0 }
 0x101   :  { %v357_v31 = vmul.f32 %v1574_v4, %v212_v29 }
 0x102   :  { %v371_v35 = vpack.c.bf16 %v359_v28, %v358_v25 }
 0x103   :  { %v370_v37 = vpack.c.bf16 %v357_v31, %v356_v30 }
 0x105   :  { %v1141_v38 = vpop.f32.mrb[8].mxu0  ;;  %1167 = vmatprep.mubr.bf16.mxu1 %v370_v37 }
 0x106   :  { %v225_v40 = vpop.f32.mrb[9].mxu0  ;;  %1168 = vmatmul.mubr.bf16.gmra.mrb[4].mxu1 %v371_v35  ;;  %v362_v43 = vmul.f32 %v1141_v38, %v1592_v34 }
 0x107   :  { %v1142_v41 = vpop.f32.mrb[10].mxu0  ;;  %v360_v47 = vmul.f32 %v1584_v18, %v225_v40 }
 0x108   :  { %v363_v44 = vmul.f32 %v1142_v41, %v1594_v36  ;;  %v228_v45 = vpop.f32.mrb[11].mxu0 }
 0x109   :  { %v361_v48 = vmul.f32 %v1586_v19, %v228_v45 }
 0x10a   :  { %v373_v49 = vpack.c.bf16 %v363_v44, %v362_v43 }
 0x10b   :  { %v372_v50 = vpack.c.bf16 %v361_v48, %v360_v47 }
 0x10d   :  { %v1145_v51 = vpop.f32.mrb[12].mxu0  ;;  %1171 = vmatprep.mubr.bf16.mxu1 %v372_v50 }
 0x10e   :  { %v241_v53 = vpop.f32.mrb[13].mxu0  ;;  %1172 = vmatmul.mubr.bf16.gmra.mrb[8].mxu1 %v373_v49  ;;  %v366_v56 = vmul.f32 %v1145_v51, %v1604_v52 }
 0x10f   :  { %v1146_v55 = vpop.f32.mrb[14].mxu0  ;;  %v364_v59 = vmul.f32 %v1596_v42, %v241_v53 }
 0x110   :  { %v367_v57 = vmul.f32 %v1146_v55, %v1606_v54  ;;  %v244_v58 = vpop.f32.mrb[15].mxu0 }
 0x111   :  { %v365_v60 = vmul.f32 %v1600_v46, %v244_v58 }
 0x112   :  { %v375_v61 = vpack.c.bf16 %v367_v57, %v366_v56 }
 0x113   :  { %v374_v62 = vpack.c.bf16 %v365_v60, %v364_v59 }
 0x115   :  { %1175 = vmatprep.mubr.bf16.mxu1 %v374_v62 }
 0x116   :  { %1176 = vmatmul.mubr.bf16.gmra.mrb[12].mxu1 %v375_v61 }
 0x117   :  { %1227 = vmatprep.mubr.bf16.mxu1 %v1369_v5 }
 0x1d1   :  { %v1165_v11 = vpop.f32.mrb[0].mxu1 }
 0x1d2   :  { %v490_v12 = vadd.f32 %v1165_v11, %v1033_v10  ;;  %v481_v13 = vpop.f32.mrb[1].mxu1 }
 0x1d3   :  { %v482_v5 = vadd.f32 %v1033_v10, %v481_v13  ;;  %v1166_v14 = vpop.f32.mrb[2].mxu1 }
 0x1d4   :  { %v493_v15 = vadd.f32 %v1166_v14, %v1033_v10  ;;  %v484_v16 = vpop.f32.mrb[3].mxu1  ;;  %v546_v22 = vmax.f32 %v490_v12, 0.0 }
 0x1d5   :  { %v485_v17 = vadd.f32 %v1033_v10, %v484_v16  ;;  %v544_v24 = vmax.f32 %v482_v5, 0.0 }
 0x1d6   :  { %v547_v23 = vmax.f32 %v493_v15, 0.0 }
 0x1d7   :  { %v545_v25 = vmax.f32 %v485_v17, 0.0 }
 0x1d8   :  { %v577_v28 = vpack.c.bf16 %v547_v23, %v546_v22 }
 0x1d9   :  { %v576_v29 = vpack.c.bf16 %v545_v25, %v544_v24  ;;  %v1169_v30 = vpop.f32.mrb[4].mxu1 }
 0x1da   :  { %v506_v31 = vadd.f32 %v1169_v30, %v1033_v10  ;;  %v497_v35 = vpop.f32.mrb[5].mxu1 }
 0x1db   :  { %v498_v37 = vadd.f32 %v1033_v10, %v497_v35  ;;  %v1170_v38 = vpop.f32.mrb[6].mxu1  ;;  %1195 = vmatprep.mubr.bf16.mxu0 %v576_v29  ;;  %v748_v35 = vpop.permute.xlu0 %747 }
 0x1dc   :  { %v509_v40 = vadd.f32 %v1170_v38, %v1033_v10  ;;  %v500_v41 = vpop.f32.mrb[7].mxu1  ;;  %1196 = vmatmul.mubr.bf16.vlgmr.msra.gmra.mrb[16].mxu0 %v577_v28  ;;  %v550_v44 = vmax.f32 %v506_v31, 0.0 }
 0x1dd   :  { %v501_v43 = vadd.f32 %v1033_v10, %v500_v41  ;;  %v548_v47 = vmax.f32 %v498_v37, 0.0  ;;  %v753_v37 = vpop.permute.xlu1 %752 }
 0x1de   :  { %v551_v45 = vmax.f32 %v509_v40, 0.0 }
 0x1df   :  { %v549_v48 = vmax.f32 %v501_v43, 0.0  ;;  %v758_v38 = vpop.permute.xlu0 %757 }
 0x1e0   :  { %v579_v49 = vpack.c.bf16 %v551_v45, %v550_v44 }
 0x1e1   :  { %v578_v50 = vpack.c.bf16 %v549_v48, %v548_v47  ;;  %v1173_v51 = vpop.f32.mrb[8].mxu1  ;;  %v763_v40 = vpop.permute.xlu1 %762 }
 0x1e2   :  { %v522_v53 = vadd.f32 %v1173_v51, %v1033_v10  ;;  %v513_v55 = vpop.f32.mrb[9].mxu1 }
 0x1e3   :  { %v514_v56 = vadd.f32 %v1033_v10, %v513_v55  ;;  %v1174_v57 = vpop.f32.mrb[10].mxu1  ;;  %1199 = vmatprep.mubr.bf16.mxu0 %v578_v50  ;;  %v768_v41 = vpop.permute.xlu0 %767 }
 0x1e4   :  { %v525_v58 = vadd.f32 %v1174_v57, %v1033_v10  ;;  %v516_v59 = vpop.f32.mrb[11].mxu1  ;;  %1200 = vmatmul.mubr.bf16.gmra.mrb[20].mxu0 %v579_v49  ;;  %v554_v61 = vmax.f32 %v522_v53, 0.0 }
 0x1e5   :  { %v517_v60 = vadd.f32 %v1033_v10, %v516_v59  ;;  %v552_v6 = vmax.f32 %v514_v56, 0.0  ;;  %v773_v43 = vpop.permute.xlu1 %772 }
 0x1e6   :  { %v555_v62 = vmax.f32 %v525_v58, 0.0 }
 0x1e7   :  { %v553_v8 = vmax.f32 %v517_v60, 0.0  ;;  %v778_v45 = vpop.permute.xlu0 %777 }
 0x1e8   :  { %v581_v11 = vpack.c.bf16 %v555_v62, %v554_v61 }
 0x1e9   :  { %v580_v12 = vpack.c.bf16 %v553_v8, %v552_v6  ;;  %v1177_v13 = vpop.f32.mrb[12].mxu1  ;;  %v783_v48 = vpop.permute.xlu1 %782 }
 0x1ea   :  { %v538_v5 = vadd.f32 %v1177_v13, %v1033_v10  ;;  %v529_v14 = vpop.f32.mrb[13].mxu1 }
 0x1eb   :  { %v530_v15 = vadd.f32 %v1033_v10, %v529_v14  ;;  %v1178_v16 = vpop.f32.mrb[14].mxu1  ;;  %1203 = vmatprep.mubr.bf16.mxu0 %v580_v12  ;;  %v788_v58 = vpop.permute.xlu0 %787 }
 0x1ec   :  { %v541_v17 = vadd.f32 %v1178_v16, %v1033_v10  ;;  %v532_v22 = vpop.f32.mrb[15].mxu1  ;;  %1204 = vmatmul.mubr.bf16.gmra.mrb[24].mxu0 %v581_v11  ;;  %v558_v24 = vmax.f32 %v538_v5, 0.0 }
 0x1ed   :  { %v533_v23 = vadd.f32 %v1033_v10, %v532_v22  ;;  %v556_v28 = vmax.f32 %v530_v15, 0.0  ;;  %v793_v59 = vpop.permute.xlu1 %792 }
 0x1ee   :  { %v559_v25 = vmax.f32 %v541_v17, 0.0 }
 0x1ef   :  { %v557_v29 = vmax.f32 %v533_v23, 0.0  ;;  %v798_v5 = vpop.permute.xlu0 %797 }
 0x1f0   :  { %v583_v30 = vpack.c.bf16 %v559_v25, %v558_v24 }
 0x1f1   :  { %v582_v31 = vpack.c.bf16 %v557_v29, %v556_v28  ;;  %v803_v15 = vpop.permute.xlu1 %802 }
 0x1f3   :  { %1207 = vmatprep.mubr.bf16.mxu0 %v582_v31  ;;  %v808_v24 = vpop.permute.xlu0 %807 }
 0x1f4   :  { %1208 = vmatmul.mubr.bf16.gmra.mrb[28].mxu0 %v583_v30 }
 0x1f5   :  { %v813_v30 = vpop.permute.xlu1 %812 }
 0x2af   :  { %v1197_v44 = vpop.f32.mrb[16].mxu0 }
 0x2b0   :  { %v682_v47 = vpop.f32.mrb[17].mxu0  ;;  %v827_v10 = vmul.f32 %v1197_v44, %v758_v38  ;;  %v823_v44 = vpop.permute.xlu1 %822 }
 0x2b1   :  { %v1198_v49 = vpop.f32.mrb[18].mxu0  ;;  %v825_v53 = vmul.f32 %v748_v35, %v682_v47 }
 0x2b2   :  { %v828_v50 = vmul.f32 %v1198_v49, %v763_v40  ;;  %v685_v51 = vpop.f32.mrb[19].mxu0 }
 0x2b3   :  { %v826_v55 = vmul.f32 %v753_v37, %v685_v51 }
 0x2b4   :  { %v842_v56 = vpack.c.bf16 %v828_v50, %v827_v10 }
 0x2b5   :  { %v841_v57 = vpack.c.bf16 %v826_v55, %v825_v53 }
 0x2b7   :  { %v1201_v60 = vpop.f32.mrb[20].mxu0  ;;  %1211 = vmatprep.subr.bf16.mxu1 %v841_v57 }
 0x2b8   :  { %v698_v61 = vpop.f32.mrb[21].mxu0  ;;  %1212 = vmatpush3.bf16.msra.mxu1 %v841_v57  ;;  %v831_v6 = vmul.f32 %v1201_v60, %v778_v45 }
 0x2b9   :  { %v1202_v62 = vpop.f32.mrb[22].mxu0  ;;  %1213 = vmatprep.subr.bf16.mxu1 %v842_v56  ;;  %v829_v12 = vmul.f32 %v768_v41, %v698_v61  ;;  %v818_v41 = vpop.permute.xlu0 %817 }
 0x2ba   :  { %v832_v8 = vmul.f32 %v1202_v62, %v783_v48  ;;  %v701_v11 = vpop.f32.mrb[23].mxu0 }
 0x2bb   :  { %v830_v13 = vmul.f32 %v773_v43, %v701_v11 }
 0x2bc   :  { %v844_v14 = vpack.c.bf16 %v832_v8, %v831_v6  ;;  %1214 = vmatpush3.bf16.msra.mxu1 %v842_v56  ;;  %v1632_v56 = vld [vmem:[%s1685_s7] ss:$0 sm:$0xff]  ;;  %s1306_s7 = smov [#allocation2]  }
 0x2bd   :  { %v843_v16 = vpack.c.bf16 %v830_v13, %v829_v12  ;;  %s1006_s14 = sshll.u32 %s1306_s7, 4  ;;  %s1007_s14 = int_to_ptr.vmem [resolvable:$true] %s1006_s14 }
 0x2be   :  { %s1281_s15 = scalar_lea.vmem %s1007_s14, 2048  ;;  %p1286_p1 = scmp.lt.s32.totalorder %s1007_s14, %s1007_s14 }
 0x2bf   :  { %v1205_v17 = vpop.f32.mrb[24].mxu0  ;;  %1215 = vmatprep.subr.bf16.mxu1 %v843_v16  ;;  %p1282_p0 = scmp.ne.s32.totalorder %s1007_s14, %s1281_s15  ;;  %p1287_p2 = scmp.lt.s32.totalorder %s1281_s15, %s1281_s15 }
 0x2c0   :  { %v714_v22 = vpop.f32.mrb[25].mxu0  ;;  %1216 = vmatpush3.bf16.msra.mxu1 %v843_v16  ;;  %v835_v25 = vmul.f32 %v1205_v17, %v798_v5 }
 0x2c1   :  { %v1206_v23 = vpop.f32.mrb[26].mxu0  ;;  %1217 = vmatprep.subr.bf16.mxu1 %v844_v14  ;;  %v833_v31 = vmul.f32 %v788_v58, %v714_v22  ;;  %p1288_p3 = por %p1287_p2, %p1286_p1 }
 0x2c2   :  { %v836_v28 = vmul.f32 %v1206_v23, %v803_v15  ;;  %v717_v29 = vpop.f32.mrb[27].mxu0 }
 0x2c3   :  { %v834_v35 = vmul.f32 %v793_v59, %v717_v29  ;;  %p1289_p4 = pnand %p1288_p3, %p1282_p0 }
 0x2c4   :  { %v846_v37 = vpack.c.bf16 %v836_v28, %v835_v25  ;;  %1218 = vmatpush3.bf16.msra.mxu1 %v844_v14 }
 0x2c5   :  { %v845_v38 = vpack.c.bf16 %v834_v35, %v833_v31 }
 0x2c7   :  { %v1209_v40 = vpop.f32.mrb[28].mxu0  ;;  %1219 = vmatprep.subr.bf16.mxu1 %v845_v38 }
 0x2c8   :  { %v730_v43 = vpop.f32.mrb[29].mxu0  ;;  %1220 = vmatpush3.bf16.msra.mxu1 %v845_v38  ;;  %v839_v47 = vmul.f32 %v1209_v40, %v818_v41 }
 0x2c9   :  { %v1210_v45 = vpop.f32.mrb[30].mxu0  ;;  %1221 = vmatprep.subr.bf16.mxu1 %v846_v37  ;;  %v837_v10 = vmul.f32 %v808_v24, %v730_v43 }
 0x2ca   :  { %v840_v48 = vmul.f32 %v1210_v45, %v823_v44  ;;  %v733_v49 = vpop.f32.mrb[31].mxu0 }
 0x2cb   :  { %v838_v50 = vmul.f32 %v813_v30, %v733_v49 }
 0x2cc   :  { %v848_v51 = vpack.c.bf16 %v840_v48, %v839_v47  ;;  %1222 = vmatpush3.bf16.msra.mxu1 %v846_v37 }
 0x2cd   :  { %v847_v53 = vpack.c.bf16 %v838_v50, %v837_v10 }
 0x2cf   :  { %1223 = vmatprep.subr.bf16.mxu1 %v847_v53 }
 0x2d0   :  { %1224 = vmatpush3.bf16.msra.mxu1 %v847_v53 }
 0x2d1   :  { %1225 = vmatprep.subr.bf16.mxu1 %v848_v51 }
 0x2d4   :  { %1226 = vmatpush3.bf16.msra.mxu1 %v848_v51 }
 0x2d7   :  { %1228 = vmatmul.mubr.bf16.vlgmr.msra.gmra.mrb[16].mxu1 %v1417_v20 }
 0x2d8   :  { %1231 = vmatprep.mubr.bf16.mxu1 %v1422_v21 }
 0x2df   :  { %1232 = vmatmul.mubr.bf16.gmra.mrb[20].mxu1 %v1441_v26 }
 0x2e0   :  { %1235 = vmatprep.mubr.bf16.mxu1 %v1446_v27 }
 0x2e7   :  { %1236 = vmatmul.mubr.bf16.gmra.mrb[24].mxu1 %v1465_v32 }
 0x2e8   :  { %1239 = vmatprep.mubr.bf16.mxu1 %v1470_v33 }
 0x2ef   :  { %1240 = vmatmul.mubr.bf16.gmra.mrb[28].mxu1 %v1492_v39 }
 0x3aa   :  { %v1229_v55 = vpop.f32.mrb[16].mxu1 }
 0x3ab   :  { %v948_v20 = vmul.f32 %v1229_v55, %v1566_v0  ;;  %v883_v57 = vpop.f32.mrb[17].mxu1 }
 0x3ac   :  { %v946_v21 = vmul.f32 %v883_v57, %v1564_v63  ;;  %v1230_v26 = vpop.f32.mrb[18].mxu1 }
 0x3ad   :  { %v971_v27 = vadd.f32 %v1632_v56, %v948_v20  ;;  %v949_v32 = vmul.f32 %v1230_v26, %v1570_v2  ;;  %v886_v58 = vpop.f32.mrb[19].mxu1 }
 0x3ae   :  { %v969_v33 = vadd.f32 %v1632_v56, %v946_v21  ;;  %v947_v39 = vmul.f32 %v886_v58, %v1568_v1 }
 0x3af   :  { %987 = vst [vmem:[#allocation2 + $0x10] sm:$0xff] %v971_v27  ;;  %v972_v59 = vadd.f32 %v1632_v56, %v949_v32 }
 0x3b0   :  { %985 = vst [vmem:[#allocation2] sm:$0xff] %v969_v33  ;;  %v970_v60 = vadd.f32 %v1632_v56, %v947_v39 }
 0x3b1   :  { %988 = vst [vmem:[#allocation2 + $0x18] sm:$0xff] %v972_v59 }
 0x3b2   :  { %986 = vst [vmem:[#allocation2 + $0x8] sm:$0xff] %v970_v60  ;;  %v1233_v0 = vpop.f32.mrb[20].mxu1 }
 0x3b3   :  { %v952_v63 = vmul.f32 %v1233_v0, %v1576_v7  ;;  %v899_v61 = vpop.f32.mrb[21].mxu1 }
 0x3b4   :  { %v950_v62 = vmul.f32 %v899_v61, %v1572_v3  ;;  %v1234_v2 = vpop.f32.mrb[22].mxu1 }
 0x3b5   :  { %v975_v6 = vadd.f32 %v1632_v56, %v952_v63  ;;  %v953_v8 = vmul.f32 %v1234_v2, %v1578_v9  ;;  %v902_v1 = vpop.f32.mrb[23].mxu1 }
 0x3b6   :  { %v973_v11 = vadd.f32 %v1632_v56, %v950_v62  ;;  %v951_v12 = vmul.f32 %v902_v1, %v1574_v4 }
 0x3b7   :  { %991 = vst [vmem:[#allocation2 + $0x30] sm:$0xff] %v975_v6  ;;  %v976_v13 = vadd.f32 %v1632_v56, %v953_v8 }
 0x3b8   :  { %989 = vst [vmem:[#allocation2 + $0x20] sm:$0xff] %v973_v11  ;;  %v974_v5 = vadd.f32 %v1632_v56, %v951_v12 }
 0x3b9   :  { %992 = vst [vmem:[#allocation2 + $0x38] sm:$0xff] %v976_v13 }
 0x3ba   :  { %990 = vst [vmem:[#allocation2 + $0x28] sm:$0xff] %v974_v5  ;;  %v1237_v7 = vpop.f32.mrb[24].mxu1 }
 0x3bb   :  { %v956_v3 = vmul.f32 %v1237_v7, %v1592_v34  ;;  %v915_v14 = vpop.f32.mrb[25].mxu1 }
 0x3bc   :  { %v954_v15 = vmul.f32 %v915_v14, %v1584_v18  ;;  %v1238_v9 = vpop.f32.mrb[26].mxu1 }
 0x3bd   :  { %v979_v16 = vadd.f32 %v1632_v56, %v956_v3  ;;  %v957_v17 = vmul.f32 %v1238_v9, %v1594_v36  ;;  %v918_v4 = vpop.f32.mrb[27].mxu1 }
 0x3be   :  { %v977_v22 = vadd.f32 %v1632_v56, %v954_v15  ;;  %v955_v23 = vmul.f32 %v918_v4, %v1586_v19 }
 0x3bf   :  { %995 = vst [vmem:[#allocation2 + $0x50] sm:$0xff] %v979_v16  ;;  %v980_v24 = vadd.f32 %v1632_v56, %v957_v17 }
 0x3c0   :  { %993 = vst [vmem:[#allocation2 + $0x40] sm:$0xff] %v977_v22  ;;  %v978_v25 = vadd.f32 %v1632_v56, %v955_v23 }
 0x3c1   :  { %996 = vst [vmem:[#allocation2 + $0x58] sm:$0xff] %v980_v24 }
 0x3c2   :  { %994 = vst [vmem:[#allocation2 + $0x48] sm:$0xff] %v978_v25  ;;  %v1241_v34 = vpop.f32.mrb[28].mxu1 }
 0x3c3   :  { %v960_v18 = vmul.f32 %v1241_v34, %v1604_v52  ;;  %v931_v28 = vpop.f32.mrb[29].mxu1 }
 0x3c4   :  { %v958_v29 = vmul.f32 %v931_v28, %v1596_v42  ;;  %v1242_v36 = vpop.f32.mrb[30].mxu1 }
 0x3c5   :  { %v983_v30 = vadd.f32 %v1632_v56, %v960_v18  ;;  %v961_v19 = vmul.f32 %v1242_v36, %v1606_v54  ;;  %v934_v31 = vpop.f32.mrb[31].mxu1 }
 0x3c6   :  { %v981_v35 = vadd.f32 %v1632_v56, %v958_v29  ;;  %v959_v37 = vmul.f32 %v934_v31, %v1600_v46 }
 0x3c7   :  { %999 = vst [vmem:[#allocation2 + $0x70] sm:$0xff] %v983_v30  ;;  %v984_v38 = vadd.f32 %v1632_v56, %v961_v19 }
 0x3c8   :  { %997 = vst [vmem:[#allocation2 + $0x60] sm:$0xff] %v981_v35  ;;  %v982_v52 = vadd.f32 %v1632_v56, %v959_v37 }
 0x3c9   :  { %1000 = vst [vmem:[#allocation2 + $0x78] sm:$0xff] %v984_v38 }
 0x3ca   :  { %998 = vst [vmem:[#allocation2 + $0x68] sm:$0xff] %v982_v52 }
 0x3cb   :  { %1292 = shalt.err (!%p1289_p4)
}
 0x3cc   :  { %s1293_s18 = scalar_lea.hbm %s1686_s8, 2048 }
 0x3cd   :  { %p1294_p5 = scmp.ne.s32.totalorder %s1686_s8, %s1293_s18  ;;  %p1297_p6 = scmp.lt.u32.totalorder %s1293_s18, %s1686_s8 }
 0x3cf   :  { %p1299_p7 = pnand %p1297_p6, %p1294_p5 }
 0x3d1   :  { %1302 = shalt.err (!%p1299_p7)
}
 0x3d2   :  { %s1307_s21 = smov 128   ;;  %s1308_s22 = smov 8  }
 0x3d3   :  { %1012 = dma.vmem_to_hbm [thread:$0]  %s1007_s14, 2048, %s1686_s8, [#allocation3], %s1307_s21, %s1307_s21, %s1308_s22  }
 0x3d4   :  { %1303 = dma.done.wait [#allocation3], 2048  }
 0x3d5   :  { %1304 = vsyncadd [#allocation3], 4294965248 }
 0x3d6   :  { %1016 = vsyncpa [#allocation3], 1 }

</bundles_post_ra>
